<compile_context>
chip_gen: v5e
topology: v5e:2x2
jax: 0.10.0
libtpu: 0.0.40
codegen_flags: <defaults>
</compile_context>

<pallas_src>
import functools

import jax
import jax.numpy as jnp
from jax import lax
from jax.experimental import pallas as pl
from jax.experimental.pallas import tpu as pltpu

HIDDEN = 128
HEADS = 2
BN_EPS = 1e-5
LEAKY_SLOPE = 0.2
NEG_BIG = -1e9          # additive mask value for non-edges
M_GUARD = -1e4          # lower clamp on the online-softmax running max
TM_MAX = 256            # destination-row tile
TK_MAX = 512            # source-column tile


def _round_up(n, m):
    return ((n + m - 1) // m) * m


def _pad_rows(x, n_rows):
    if x.shape[0] == n_rows:
        return x
    return jnp.pad(x, ((0, n_rows - x.shape[0]), (0, 0)))


# ---------------------------------------------------------------------------
# Pallas kernels
# ---------------------------------------------------------------------------
def _linear_kernel(x_ref, w_ref, b_ref, o_ref):
    """recipe Linear(20->128) with eval-mode BatchNorm pre-folded into w/b."""
    o_ref[...] = (jnp.dot(x_ref[...], w_ref[...], preferred_element_type=jnp.float32)
                  + b_ref[...])


def _src_project_kernel(xs_ref, w_ref, *out_refs, renorm):
    """Head-stacked, attention-folded source projection (one 384-wide matmul).

    w_ref columns: [W_src_h0 | W_src_h1 | W_src_h0@att_h0 | W_src_h1@att_h1 | 0-pad]
    Outputs: hs_cat (bf16, 2*HIDDEN), a_src rows (f32, cols 0/1 used),
             optionally the max_norm-renormed features.
    """
    x = xs_ref[...]
    if renorm:                                           # nn.Embedding(max_norm=1.0)
        nrm = jnp.sqrt(jnp.sum(x * x, axis=-1, keepdims=True))
        scale = jnp.where(nrm > 1.0, 1.0 / (nrm + 1e-7), 1.0)
        x = x * scale
        out_refs[2][...] = x
    res = jnp.dot(x.astype(jnp.bfloat16), w_ref[...],
                  preferred_element_type=jnp.float32)    # (tile, 384) f32
    out_refs[0][...] = res[:, :2 * HIDDEN].astype(jnp.bfloat16)
    out_refs[1][...] = res[:, 2 * HIDDEN:]               # per-head a_src logits (f32)


def _flash_gat_kernel(xd_ref, hs_ref, asT_ref, bias_ref, wadst_ref, gbias_ref,
                      o_ref, ad_scr, m_scr, l_scr, acc_scr, *, add_residual):
    """Tiled online-softmax GATConv((H,H), H, heads=2, concat=False)."""
    ki = pl.program_id(1)

    @pl.when(ki == 0)
    def _init():
        # a_dst = x_dst @ (W_dst @ att_dst), folded into one MXU pass; cols 0/1 used.
        ad_scr[...] = jnp.dot(xd_ref[...].astype(jnp.bfloat16), wadst_ref[...],
                              preferred_element_type=jnp.float32)
        m_scr[...] = jnp.full_like(m_scr, -1e30)
        l_scr[...] = jnp.zeros_like(l_scr)
        acc_scr[...] = jnp.zeros_like(acc_scr)

    bias = bias_ref[...].astype(jnp.float32)             # (tm, tk) log-count / -1e9
    hs_all = hs_ref[...]                                  # (tk, 2*HIDDEN) bf16

    for h in range(HEADS):                                # static unroll, heads == 2
        a_d = ad_scr[:, h:h + 1]                          # (tm, 1)  f32
        a_s = asT_ref[h:h + 1, :]                         # (1, tk)  f32 (pre-transposed)
        e = a_d + a_s
        e = jnp.where(e >= 0, e, LEAKY_SLOPE * e) + bias  # leaky_relu + mask/log-count
        m_prev = m_scr[h]
        m_new = jnp.maximum(m_prev, jnp.max(e, axis=-1, keepdims=True))
        m_new = jnp.maximum(m_new, M_GUARD)               # all-masked-row guard
        alpha = jnp.exp(m_prev - m_new)
        p = jnp.exp(e - m_new)                            # masked entries underflow to 0
        l_scr[h] = alpha * l_scr[h] + jnp.sum(p, axis=-1, keepdims=True)
        acc_scr[h] = alpha * acc_scr[h] + jnp.dot(
            p.astype(jnp.bfloat16), hs_all[:, h * HIDDEN:(h + 1) * HIDDEN],
            preferred_element_type=jnp.float32)
        m_scr[h] = m_new

    @pl.when(ki == pl.num_programs(1) - 1)
    def _finalize():
        out = jnp.zeros(o_ref.shape, jnp.float32)
        for h in range(HEADS):
            l = l_scr[h]
            inv = jnp.where(l > 0, pl.reciprocal(l, approx=True), 0.0)
            out = out + acc_scr[h] * inv
        out = out * (1.0 / HEADS) + gbias_ref[...]        # mean over heads + bias
        if add_residual:                                  # fused recipe.x residual
            out = out + xd_ref[...]
        o_ref[...] = out


# ---------------------------------------------------------------------------
# Wrappers
# ---------------------------------------------------------------------------
def recipe_linear_bn(x, params):
    """Linear(20->128) with eval-mode BatchNorm folded into scale/shift."""
    nr, in_dim = x.shape
    inv = params["bn_gamma"] * lax.rsqrt(params["bn_running_var"] + BN_EPS)
    w_eff = params["recipe_linear_w"] * inv
    b_eff = (params["recipe_linear_b"] - params["bn_running_mean"]) * inv + params["bn_beta"]

    tn = min(512, _round_up(nr, 8))
    nr_p = _round_up(nr, tn)
    x_p = _pad_rows(x, nr_p)
    out = pl.pallas_call(
        _linear_kernel,
        out_shape=jax.ShapeDtypeStruct((nr_p, HIDDEN), jnp.float32),
        grid=(nr_p // tn,),
        in_specs=[pl.BlockSpec((tn, in_dim), lambda i: (i, 0)),
                  pl.BlockSpec((in_dim, HIDDEN), lambda i: (0, 0)),
                  pl.BlockSpec((1, HIDDEN), lambda i: (0, 0))],
        out_specs=pl.BlockSpec((tn, HIDDEN), lambda i: (i, 0)),
        compiler_params=pltpu.CompilerParams(dimension_semantics=("parallel",)),
    )(x_p, w_eff, b_eff)
    return out[:nr]


def _src_project(xs_p, w_aug, tk, renorm):
    ns_p = xs_p.shape[0]
    out_shape = [jax.ShapeDtypeStruct((ns_p, 2 * HIDDEN), jnp.bfloat16),
                 jax.ShapeDtypeStruct((ns_p, HIDDEN), jnp.float32)]
    out_specs = [pl.BlockSpec((tk, 2 * HIDDEN), lambda i: (i, 0)),
                 pl.BlockSpec((tk, HIDDEN), lambda i: (i, 0))]
    if renorm:
        out_shape.append(jax.ShapeDtypeStruct((ns_p, HIDDEN), jnp.float32))
        out_specs.append(pl.BlockSpec((tk, HIDDEN), lambda i: (i, 0)))
    return pl.pallas_call(
        functools.partial(_src_project_kernel, renorm=renorm),
        out_shape=tuple(out_shape),
        grid=(ns_p // tk,),
        in_specs=[pl.BlockSpec((tk, HIDDEN), lambda i: (i, 0)),
                  pl.BlockSpec((HIDDEN, 3 * HIDDEN), lambda i: (0, 0))],
        out_specs=tuple(out_specs),
        compiler_params=pltpu.CompilerParams(dimension_semantics=("parallel",)),
    )(xs_p, w_aug)


def _adjacency_bias(edge_index, ns, nd, ns_p, nd_p):
    """Additive attention bias: log(edge multiplicity) for edges, -1e9 otherwise.

    Follows PyG GATConv: remove_self_loops then add_self_loops for node ids
    < min(Ns, Nd); parallel (duplicate) edges keep their multiplicity.
    Stored in bf16 to quarter the streamed-adjacency HBM/VMEM footprint vs f32.
    """
    src, dst = edge_index[0], edge_index[1]
    keep = (src != dst).astype(jnp.float32)
    counts = jnp.zeros((nd_p, ns_p), jnp.float32).at[dst, src].add(keep)
    n_loop = min(ns, nd)
    diag = jnp.arange(n_loop)
    counts = counts.at[diag, diag].add(1.0)
    bias = jnp.where(counts > 0, jnp.log(counts), NEG_BIG)
    return bias.astype(jnp.bfloat16)


def _flash_gat(xd_p, hs_cat, a_src_T, bias, wa_dst, gat_bias, *, tm, tk, add_residual):
    nd_p = xd_p.shape[0]
    ns_p = hs_cat.shape[0]
    grid = (nd_p // tm, ns_p // tk)

    cost = pl.CostEstimate(
        flops=(2 * HEADS * nd_p * ns_p * HIDDEN          # p @ hs aggregation
               + 2 * nd_p * HIDDEN * HIDDEN              # a_dst projection
               + 8 * HEADS * nd_p * ns_p),               # score / softmax elementwise
        transcendentals=HEADS * nd_p * ns_p,
        bytes_accessed=(bias.size * 2 + hs_cat.size * 2 + a_src_T.size * 4
                        + xd_p.size * 4 + wa_dst.size * 2 + nd_p * HIDDEN * 4))

    return pl.pallas_call(
        functools.partial(_flash_gat_kernel, add_residual=add_residual),
        out_shape=jax.ShapeDtypeStruct((nd_p, HIDDEN), jnp.float32),
        grid_spec=pltpu.PrefetchScalarGridSpec(
            num_scalar_prefetch=0,
            grid=grid,
            in_specs=[
                pl.BlockSpec((tm, HIDDEN), lambda i, j: (i, 0)),        # x_dst
                pl.BlockSpec((tk, 2 * HIDDEN), lambda i, j: (j, 0)),    # hs (both heads)
                pl.BlockSpec((8, tk), lambda i, j: (0, j)),             # a_src (transposed)
                pl.BlockSpec((tm, tk), lambda i, j: (i, j)),            # adjacency bias
                pl.BlockSpec((HIDDEN, HIDDEN), lambda i, j: (0, 0)),    # W_dst @ att_dst
                pl.BlockSpec((1, HIDDEN), lambda i, j: (0, 0)),         # GAT output bias
            ],
            out_specs=pl.BlockSpec((tm, HIDDEN), lambda i, j: (i, 0)),
            scratch_shapes=[
                pltpu.VMEM((tm, HIDDEN), jnp.float32),          # a_dst (cols 0/1 used)
                pltpu.VMEM((HEADS, tm, 1), jnp.float32),        # running max m
                pltpu.VMEM((HEADS, tm, 1), jnp.float32),        # running denom l
                pltpu.VMEM((HEADS, tm, HIDDEN), jnp.float32),   # running numerator acc
            ]),
        compiler_params=pltpu.CompilerParams(
            dimension_semantics=("parallel", "arbitrary"),
            vmem_limit_bytes=48 * 1024 * 1024),
        cost_estimate=cost,
    )(xd_p, hs_cat, a_src_T, bias, wa_dst, gat_bias)


def gat_conv(x_src, x_dst, p, edge_index, *, add_residual, renorm_src=False):
    """PyG GATConv((128,128), 128, heads=2, concat=False) via tiled flash-GAT."""
    ns, nd = x_src.shape[0], x_dst.shape[0]
    tm = min(TM_MAX, _round_up(nd, 8))
    nd_p = _round_up(nd, tm)
    tk = min(TK_MAX, _round_up(ns, 128))
    ns_p = _round_up(ns, tk)

    xs_p = _pad_rows(x_src, ns_p)
    xd_p = _pad_rows(x_dst, nd_p)

    # Head-stacked, attention-folded projection weights (bf16 MXU operands).
    w_aug = jnp.concatenate(
        [p["w_src"][0], p["w_src"][1],
         (p["w_src"][0] @ p["att_src"][0])[:, None],
         (p["w_src"][1] @ p["att_src"][1])[:, None],
         jnp.zeros((HIDDEN, HIDDEN - HEADS), jnp.float32)], axis=1).astype(jnp.bfloat16)
    wa_dst = jnp.concatenate(
        [(p["w_dst"][0] @ p["att_dst"][0])[:, None],
         (p["w_dst"][1] @ p["att_dst"][1])[:, None],
         jnp.zeros((HIDDEN, HIDDEN - HEADS), jnp.float32)], axis=1).astype(jnp.bfloat16)

    proj = _src_project(xs_p, w_aug, tk, renorm_src)
    hs_cat, a_rows = proj[0], proj[1]
    # Keep a_src in (head, node) layout so the flash kernel never transposes per tile.
    a_src_T = jnp.transpose(a_rows[:, :8])                # (8, ns_p) f32, rows 0/1 used

    bias = _adjacency_bias(edge_index, ns, nd, ns_p, nd_p)

    out = _flash_gat(xd_p, hs_cat, a_src_T, bias, wa_dst, p["bias"],
                     tm=tm, tk=tk, add_residual=add_residual)[:nd]
    if renorm_src:
        return out, proj[2][:ns]
    return out


# ---------------------------------------------------------------------------
# Parameters (deterministic synthetic init — shapes from the module __init__)
# ---------------------------------------------------------------------------
def _glorot(key, shape):
    fan_in, fan_out = shape[-2], shape[-1]
    lim = jnp.sqrt(6.0 / (fan_in + fan_out))
    return jax.random.uniform(key, shape, jnp.float32, -lim, lim)


def init_params(key, num_users, num_recipes, num_ingredients, recipe_feat_dim):
    ks = jax.random.split(key, 8)

    def gat_params(k):
        k1, k2, k3, k4 = jax.random.split(k, 4)
        return dict(
            w_src=_glorot(k1, (HEADS, HIDDEN, HIDDEN)),
            w_dst=_glorot(k2, (HEADS, HIDDEN, HIDDEN)),
            att_src=_glorot(k3, (HEADS, HIDDEN)),
            att_dst=_glorot(k4, (HEADS, HIDDEN)),
            bias=jnp.zeros((1, HIDDEN), jnp.float32),
        )

    return dict(
        user_embedding=jax.random.normal(ks[0], (num_users, HIDDEN), jnp.float32),
        recipe_linear_w=_glorot(ks[1], (recipe_feat_dim, HIDDEN)),
        recipe_linear_b=jnp.zeros((1, HIDDEN), jnp.float32),
        bn_gamma=jnp.ones((1, HIDDEN), jnp.float32),
        bn_beta=jnp.zeros((1, HIDDEN), jnp.float32),
        bn_running_mean=jnp.zeros((1, HIDDEN), jnp.float32),
        bn_running_var=jnp.ones((1, HIDDEN), jnp.float32),
        # StaticEmbeddingLoader tables (pandas lookup -> plain array gather)
        ingredient_table=0.1 * jax.random.normal(ks[2], (num_ingredients, HIDDEN), jnp.float32),
        image_table=0.1 * jax.random.normal(ks[3], (num_recipes, HIDDEN), jnp.float32),
        ing_to_recipe=gat_params(ks[4]),
        user_recipe_gat=gat_params(ks[5]),
    )


# ---------------------------------------------------------------------------
# Forward pass (mirrors RecommendationModel.forward on a hetero-graph batch)
# ---------------------------------------------------------------------------
def forward(params, data):
    # recipe: Linear(20 -> 128) + BatchNorm (eval mode, running stats folded)
    recipe_feat = recipe_linear_bn(data["recipe_x"], params)
    nr = recipe_feat.shape[0]

    # ingredient / image: StaticEmbeddingLoader gathers
    ingredient_x = params["ingredient_table"][data["ingredient_id"], :]
    visual_feature = params["image_table"][data["recipe_id"], :]
    intention_feature = jnp.ones((nr, HIDDEN), jnp.float32)
    taste_feature = jnp.ones((nr, HIDDEN), jnp.float32)

    # recipe.x = recipe.x + ing_to_recipe((ingredient.x, recipe.x), edge_index)
    # (residual add fused into the GAT finalize)
    recipe_x = gat_conv(ingredient_x, recipe_feat, params["ing_to_recipe"],
                        data["edge_ing_recipe"], add_residual=True)

    # recipe.x = user_recipe_gat((user.x, recipe.x), edge_index)
    # (nn.Embedding max_norm=1.0 renorm fused into the source-projection kernel)
    user_raw = params["user_embedding"][data["user_id"], :]
    recipe_out, user_x = gat_conv(user_raw, recipe_x, params["user_recipe_gat"],
                                  data["edge_user_recipe"], add_residual=False,
                                  renorm_src=True)

    return dict(
        user_x=user_x,
        ingredient_x=ingredient_x,
        recipe_x=recipe_out,
        recipe_visual_feature=visual_feature,
        recipe_intention_feature=intention_feature,
        recipe_taste_feature=taste_feature,
    )


# ---------------------------------------------------------------------------
if __name__ == "__main__":
    key = jax.random.PRNGKey(0)
    num_users, num_recipes, num_ingredients = 8, 8, 16
    recipe_feat_dim = 20                      # module default input_recipe_feature_dim

    k_params, k_data = jax.random.split(key)
    params = init_params(k_params, num_users, num_recipes, num_ingredients, recipe_feat_dim)

    nr = 8                                    # recipe nodes in the batch graph
    data = dict(
        user_id=jnp.array([0, 2, 4, 1, 7, 6, 3, 5], jnp.int32),
        recipe_id=jnp.arange(nr, dtype=jnp.int32),
        ingredient_id=jnp.array([0, 3, 5, 7, 9, 2, 4, 6], jnp.int32),
        recipe_x=jax.random.normal(k_data, (nr, recipe_feat_dim), jnp.float32),
        # edge_index[0] = source node idx, edge_index[1] = destination node idx
        edge_ing_recipe=jnp.array(
            [[0, 1, 2, 3, 4, 5, 6, 7, 0, 2, 5, 7],
             [0, 0, 1, 2, 3, 4, 5, 6, 3, 7, 2, 1]], jnp.int32),
        edge_user_recipe=jnp.array(
            [[0, 0, 1, 2, 3, 3, 4, 5, 6, 7],
             [0, 1, 2, 3, 4, 5, 6, 7, 0, 2]], jnp.int32),
    )

    out = forward(params, data)
    jax.block_until_ready(out)
    print("KERNEL_OK")
</pallas_src>

<mosaic_0001>
module attributes {stable_mosaic.version = 11 : i64} {
  func.func @_linear_kernel(%arg0: i32, %arg1: memref<8x20xf32, #tpu.memory_space<vmem>>, %arg2: memref<20x128xf32, #tpu.memory_space<vmem>>, %arg3: memref<1x128xf32, #tpu.memory_space<vmem>>, %arg4: memref<8x128xf32, #tpu.memory_space<vmem>>) attributes {dimension_semantics = [#tpu.dimension_semantics<parallel>], iteration_bounds = array<i64: 1>, scalar_prefetch = 0 : i64, scratch_operands = 0 : i64, tpu.core_type = #tpu.core_type<tc>, window_params = [{transform_indices = @transform_0, window_bounds = array<i64: 8, 20>}, {pipeline_mode = #tpu.pipeline_mode<synchronous>, transform_indices = @transform_1, window_bounds = array<i64: 20, 128>}, {pipeline_mode = #tpu.pipeline_mode<synchronous>, transform_indices = @transform_2, window_bounds = array<i64: 1, 128>}, {transform_indices = @transform_3, window_bounds = array<i64: 8, 128>}]} {
    %c0 = arith.constant 0 : index
    %c0_0 = arith.constant 0 : index
    %0 = vector.load %arg1[%c0, %c0_0] : memref<8x20xf32, #tpu.memory_space<vmem>>, vector<8x20xf32>
    %c0_1 = arith.constant 0 : index
    %c0_2 = arith.constant 0 : index
    %1 = vector.load %arg2[%c0_1, %c0_2] : memref<20x128xf32, #tpu.memory_space<vmem>>, vector<20x128xf32>
    %cst = arith.constant dense<0.000000e+00> : vector<8x128xf32>
    %2 = tpu.matmul %0, %1, %cst {dimension_numbers = #tpu.dot_dimension_numbers<[1], [0], [0], [1], [0, 0, 1, 1], [], []>} : vector<8x20xf32>, vector<20x128xf32>, vector<8x128xf32> -> vector<8x128xf32>
    %c0_3 = arith.constant 0 : index
    %c0_4 = arith.constant 0 : index
    %3 = vector.load %arg3[%c0_3, %c0_4] : memref<1x128xf32, #tpu.memory_space<vmem>>, vector<1x128xf32>
    %4 = vector.broadcast %3 : vector<1x128xf32> to vector<8x128xf32>
    %5 = arith.addf %2, %4 : vector<8x128xf32>
    %c0_5 = arith.constant 0 : index
    %c0_6 = arith.constant 0 : index
    %6 = vector.load %arg4[%c0_5, %c0_6] : memref<8x128xf32, #tpu.memory_space<vmem>>, vector<8x128xf32>
    tpu.vector_store %arg4[%c0_5, %c0_6], %5 {strides = array<i32>} : memref<8x128xf32, #tpu.memory_space<vmem>>, vector<8x128xf32>,
    return
  }
  func.func @transform_0(%arg0: i32) -> (i32, i32) {
    %c0_i32 = arith.constant 0 : i32
    %c0_i32_0 = arith.constant 0 : i32
    return %arg0, %c0_i32 : i32, i32
  }
  func.func @transform_1(%arg0: i32) -> (i32, i32) {
    %c0_i32 = arith.constant 0 : i32
    %c0_i32_0 = arith.constant 0 : i32
    %c0_i32_1 = arith.constant 0 : i32
    return %c0_i32, %c0_i32_0 : i32, i32
  }
  func.func @transform_2(%arg0: i32) -> (i32, i32) {
    %c0_i32 = arith.constant 0 : i32
    %c0_i32_0 = arith.constant 0 : i32
    %c0_i32_1 = arith.constant 0 : i32
    return %c0_i32, %c0_i32_0 : i32, i32
  }
  func.func @transform_3(%arg0: i32) -> (i32, i32) {
    %c0_i32 = arith.constant 0 : i32
    %c0_i32_0 = arith.constant 0 : i32
    return %arg0, %c0_i32 : i32, i32
  }
}

</mosaic_0001>

<bundles_post_ra>
// kernel: tpu_custom_call.1
= control target key start
LH: loop header
LB: loop body
LE: loop exit
PB: predicated region body
PF: predicated region fallthrough
CT: control target
= control target key end

     0   :  { %8 = vsyncpa [#allocation3], 0  ;;  %s223_s0 = inlined_call_operand.hbm [shape: f32[8,20], index: 0, kind: input, shape index: {}]   ;;  %s224_s1 = inlined_call_operand.hbm [shape: f32[20,128], index: 1, kind: input, shape index: {}]   ;;  %s225_s2 = inlined_call_operand.vmem [shape: f32[1,128], index: 2, kind: input, shape index: {}]   ;;  %s226_s3 = inlined_call_operand.hbm [shape: f32[8,128], index: 3, kind: output, shape index: {}]  }
   0x1   :  { %9 = vsyncpa [#allocation6], 0 }
   0x2   :  { %10 = vsyncpa [#allocation4], 0  ;;  %s16_s14 = sshll.u32 %s223_s0, 4  ;;  %s186_s15 = smov [#allocation2]   ;;  %s17_s14 = int_to_ptr.hbm [resolvable:$true] %s16_s14 }
   0x3   :  { %s18_s16 = sshll.u32 %s186_s15, 4  ;;  %s26_s19 = sshll.u32 %s224_s1, 4  ;;  %s19_s16 = int_to_ptr.vmem [resolvable:$true] %s18_s16  ;;  %s27_s19 = int_to_ptr.hbm [resolvable:$true] %s26_s19 }
   0x4   :  { %21 = dma.hbm_to_vmem [thread:$0]  %s17_s14, 128, %s19_s16, [#allocation3]  }
   0x5   :  { %s187_s20 = smov [#allocation5]   ;;  %s188_s22 = smov 128  }
   0x6   :  { %s28_s21 = sshll.u32 %s187_s20, 4  ;;  %s189_s23 = smov 8   ;;  %s29_s21 = int_to_ptr.vmem [resolvable:$true] %s28_s21 }
   0x7   :  { %34 = dma.hbm_to_vmem [thread:$0]  %s27_s19, 384, %s29_s21, [#allocation6], %s188_s22, %s188_s22, %s189_s23  }
   0x8   :  { %180 = dma.done.wait [#allocation3], 128  }
   0x9   :  { %181 = vsyncadd [#allocation3], 4294967168 }
   0xa   :  { %182 = dma.done.wait [#allocation6], 384  }
   0xb   :  { %183 = vsyncadd [#allocation6], 4294966912  ;;  %vm57_vm0 = vcmask 1043456   ;;  %v48_v0 = vld [vmem:[#allocation5 + $0x10] sm:$0xf]  ;;  %v47_v1 = vld [vmem:[#allocation5 + $0x8] sm:$0xff] }
   0xc   :  { %100 = vmatpush.msk.msra.mxu0 %vm57_vm0, %v48_v0  ;;  %v46_v2 = vld [vmem:[#allocation5] sm:$0xff]  ;;  %v45_v3 = vld [vmem:[#allocation2] sm:$0xff]  ;;  %vm53_vm1 = vcmask 162816   ;;  %s190_s24 = smov [#allocation7]   ;;  %s89_s28 = sshll.u32 %s226_s3, 4  ;;  %s90_s28 = int_to_ptr.hbm [resolvable:$true] %s89_s28 }
   0xd   :  { %v107_v4 = vld [vmem:[%s225_s2] ss:$0 sm:$0xff]  ;;  %s87_s25 = sshll.u32 %s190_s24, 4  ;;  %s88_s25 = int_to_ptr.vmem [resolvable:$true] %s87_s25 }
   0xe   :  { %75 = vmatpush.msra.mxu0 %v47_v1 }
  0x10   :  { %76 = vmatpush.msra.mxu0 %v46_v2 }
  0x11   :  { %101 = vmatmul.msk.f32.vlgmr.msra.gmra.mxu0 %vm53_vm1, %v45_v3 }
  0x8e   :  { %v78_v5 = vpop.f32.mrf.mxu0 }
  0x8f   :  { %v79_v6 = vadd.f32 %v107_v4, %v78_v5 }
  0x91   :  { %81 = vst [vmem:[#allocation7] sm:$0xff] %v79_v6 }
  0x92   :  { %92 = dma.vmem_to_hbm [thread:$0]  %s88_s25, 128, %s90_s28, [#allocation4]  }
  0x93   :  { %184 = dma.done.wait [#allocation4], 128  }
  0x94   :  { %185 = vsyncadd [#allocation4], 4294967168 }
  0x95   :  { %97 = vsyncpa [#allocation3], 1 }
  0x96   :  { %98 = vsyncpa [#allocation6], 1 }
  0x97   :  { %99 = vsyncpa [#allocation4], 1 }

</bundles_post_ra>
